<compile_context>
chip_gen: v5e
topology: v5e:2x2
jax: 0.10.0
libtpu: 0.0.40
codegen_flags: <defaults>
</compile_context>

<pallas_src>
import jax
import jax.numpy as jnp
from jax.experimental import pallas as pl
from jax.experimental.pallas import tpu as pltpu

INPUT_DIM = 28 * 28   # 784


def svm_kernel(x_ref, w_ref, b_ref, o_ref):
    # x_ref: (TILE_B, 784) native dtype; w_ref: (784, 1) matching dtype (f32 for
    # integer inputs); b_ref: (1, 1) f32 in SMEM; o_ref: (1, TILE_B//128, 128) f32.
    x = x_ref[...]
    if not jnp.issubdtype(x.dtype, jnp.floating):
        # TODO(synk): on v5e/v6e integer pixels could use the i8 MXU path
        # (int dot + single f32 scale); v7x has no int MXU so we cast.
        x = x.astype(jnp.float32)
    y = jnp.dot(x, w_ref[...], preferred_element_type=jnp.float32)   # (TILE_B, 1)
    _, rows, lanes = o_ref.shape
    # Lane-dense store: (TILE_B, 1) -> (1, rows, 128); row r, lane l = batch r*128+l.
    o_ref[...] = y.reshape(1, rows, lanes) + b_ref[0, 0]


def _round_up(n, m):
    return ((n + m - 1) // m) * m


def svm_forward(x, weight, bias):
    """x: any shape with prod(trailing dims) == 784 (e.g. (B,1,28,28)), any dtype.
    weight: (1, 784) like nn.Linear.weight.  bias: (1,) like nn.Linear.bias."""
    x2d = x.reshape(-1, INPUT_DIM)                    # keep native dtype (no f32 copy)
    B = x2d.shape[0]
    itemsize = jnp.dtype(x2d.dtype).itemsize

    # ~6.3 MiB of x per pipeline buffer regardless of dtype:
    #   f32 -> 2048 rows, bf16 -> 4096, int8/u8 -> 8192.
    max_tile_b = min(8192, (2048 * 4) // itemsize)

    # Tiles are multiples of 128 rows (sublane-safe for every dtype, and makes the
    # lane-dense output reshape exact).  Aim for >=4 grid steps once B is large
    # enough so both v7x TensorCores get work and double-buffering overlaps DMA.
    b128 = _round_up(B, 128)
    tile_b = min(max_tile_b, max(128, _round_up(pl.cdiv(b128, 4), 128)))
    padded_b = _round_up(B, tile_b)
    if padded_b != B:
        x2d = jnp.pad(x2d, ((0, padded_b - B), (0, 0)))

    # Floating inputs: weight in the input dtype -> MXU eats packed bf16 natively
    # (accumulation stays f32; slightly different rounding than x.float() @ W.T).
    # Integer inputs: keep f32 weight, cast x inside the kernel.
    if jnp.issubdtype(x2d.dtype, jnp.floating):
        w_t = weight.astype(x2d.dtype).T              # (784, 1), VMEM-resident
    else:
        w_t = weight.astype(jnp.float32).T
    b2d = bias.astype(jnp.float32).reshape(1, 1)      # (1, 1) scalar -> SMEM

    n_tiles = padded_b // tile_b
    rows = tile_b // 128

    cost = pl.CostEstimate(
        flops=2 * padded_b * INPUT_DIM,
        transcendentals=0,
        bytes_accessed=(padded_b * INPUT_DIM * itemsize
                        + INPUT_DIM * jnp.dtype(w_t.dtype).itemsize
                        + padded_b * 4),
    )

    out = pl.pallas_call(
        svm_kernel,
        out_shape=jax.ShapeDtypeStruct((n_tiles, rows, 128), jnp.float32),
        grid=(n_tiles,),
        in_specs=[
            pl.BlockSpec((tile_b, INPUT_DIM), lambda i: (i, 0)),    # x: stream tiles
            pl.BlockSpec((INPUT_DIM, 1), lambda i: (0, 0)),         # W^T: resident
            pl.BlockSpec(memory_space=pltpu.MemorySpace.SMEM),      # bias scalar
        ],
        out_specs=pl.BlockSpec((1, rows, 128), lambda i: (i, 0, 0)),  # lane-dense slab
        compiler_params=pltpu.CompilerParams(
            dimension_semantics=("parallel",),        # shard tiles across v7x's 2 TCs
            vmem_limit_bytes=48 << 20,                # explicit scoped-VMEM budget
        ),
        cost_estimate=cost,
    )(x2d, w_t, b2d)

    return out.reshape(padded_b, 1)[:B]


if __name__ == "__main__":
    key = jax.random.PRNGKey(0)
    kx, kw, kb = jax.random.split(key, 3)

    # Small batch of MNIST-shaped inputs (NCHW), flattened inside svm_forward.
    B = 2
    x = jax.random.normal(kx, (B, 1, 28, 28), dtype=jnp.float32)

    # Deterministic init mimicking nn.Linear's uniform(-1/sqrt(in), 1/sqrt(in)).
    bound = 1.0 / jnp.sqrt(jnp.float32(INPUT_DIM))
    weight = jax.random.uniform(kw, (1, INPUT_DIM), minval=-bound, maxval=bound,
                                dtype=jnp.float32)
    bias = jax.random.uniform(kb, (1,), minval=-bound, maxval=bound,
                              dtype=jnp.float32)

    # f32 path (matches PyTorch's x.float() math).
    out = svm_forward(x, weight, bias)
    out = jax.block_until_ready(out)
    ref = x.reshape(-1, INPUT_DIM).astype(jnp.float32) @ weight.T + bias
    assert out.shape == (B, 1)
    assert jnp.allclose(out, ref, atol=1e-5, rtol=1e-5)

    # bf16 streaming path (native MXU bf16 x bf16 with f32 accumulation):
    # looser tolerance since the contraction rounds inputs/weights to bf16.
    out_bf16 = svm_forward(x.astype(jnp.bfloat16), weight, bias)
    out_bf16 = jax.block_until_ready(out_bf16)
    assert out_bf16.shape == (B, 1)
    assert jnp.allclose(out_bf16, ref, atol=5e-2, rtol=5e-2)

    print("KERNEL_OK")
</pallas_src>

<mosaic_0001>
module attributes {stable_mosaic.version = 11 : i64} {
  func.func @svm_kernel(%arg0: i32, %arg1: memref<128x784xf32, #tpu.memory_space<vmem>>, %arg2: memref<784x1xf32, #tpu.memory_space<vmem>>, %arg3: memref<1x1xf32, #tpu.memory_space<smem>>, %arg4: memref<1x1x128xf32, #tpu.memory_space<vmem>>) attributes {dimension_semantics = [#tpu.dimension_semantics<parallel>], iteration_bounds = array<i64: 1>, scalar_prefetch = 0 : i64, scratch_operands = 0 : i64, tpu.core_type = #tpu.core_type<tc>, window_params = [{transform_indices = @transform_0, window_bounds = array<i64: 128, 784>}, {pipeline_mode = #tpu.pipeline_mode<synchronous>, transform_indices = @transform_1, window_bounds = array<i64: 784, 1>}, {transform_indices = @transform_2, window_bounds = array<i64: 1, 1>}, {transform_indices = @transform_3, window_bounds = array<i64: 1, 1, 128>}]} {
    %c0 = arith.constant 0 : index
    %c0_0 = arith.constant 0 : index
    %0 = vector.load %arg1[%c0, %c0_0] : memref<128x784xf32, #tpu.memory_space<vmem>>, vector<128x784xf32>
    %c0_1 = arith.constant 0 : index
    %c0_2 = arith.constant 0 : index
    %1 = vector.load %arg2[%c0_1, %c0_2] : memref<784x1xf32, #tpu.memory_space<vmem>>, vector<784x1xf32>
    %cst = arith.constant dense<0.000000e+00> : vector<128x1xf32>
    %2 = tpu.matmul %0, %1, %cst {dimension_numbers = #tpu.dot_dimension_numbers<[1], [0], [0], [1], [0, 0, 1, 1], [], []>} : vector<128x784xf32>, vector<784x1xf32>, vector<128x1xf32> -> vector<128x1xf32>
    %3 = vector.shape_cast %2 : vector<128x1xf32> to vector<1x1x128xf32>
    %c0_3 = arith.constant 0 : index
    %c0_4 = arith.constant 0 : index
    %4 = memref.load %arg3[%c0_3, %c0_4] : memref<1x1xf32, #tpu.memory_space<smem>>
    %5 = vector.broadcast %4 : f32 to vector<1x1x128xf32>
    %6 = arith.addf %3, %5 : vector<1x1x128xf32>
    %c0_5 = arith.constant 0 : index
    %c0_6 = arith.constant 0 : index
    %c0_7 = arith.constant 0 : index
    %7 = vector.load %arg4[%c0_5, %c0_6, %c0_7] : memref<1x1x128xf32, #tpu.memory_space<vmem>>, vector<1x1x128xf32>
    tpu.vector_store %arg4[%c0_5, %c0_6, %c0_7], %6 {strides = array<i32>} : memref<1x1x128xf32, #tpu.memory_space<vmem>>, vector<1x1x128xf32>,
    return
  }
  func.func @transform_0(%arg0: i32) -> (i32, i32) {
    %c0_i32 = arith.constant 0 : i32
    %c0_i32_0 = arith.constant 0 : i32
    return %arg0, %c0_i32 : i32, i32
  }
  func.func @transform_1(%arg0: i32) -> (i32, i32) {
    %c0_i32 = arith.constant 0 : i32
    %c0_i32_0 = arith.constant 0 : i32
    %c0_i32_1 = arith.constant 0 : i32
    return %c0_i32, %c0_i32_0 : i32, i32
  }
  func.func @transform_2(%arg0: i32) -> (i32, i32) {
    %c0_i32 = arith.constant 0 : i32
    %c0_i32_0 = arith.constant 0 : i32
    %c0_i32_1 = arith.constant 0 : i32
    return %c0_i32, %c0_i32_0 : i32, i32
  }
  func.func @transform_3(%arg0: i32) -> (i32, i32, i32) {
    %c0_i32 = arith.constant 0 : i32
    %c0_i32_0 = arith.constant 0 : i32
    %c0_i32_1 = arith.constant 0 : i32
    return %arg0, %c0_i32, %c0_i32_0 : i32, i32, i32
  }
}

</mosaic_0001>

<bundles_post_ra>
// kernel: tpu_custom_call.1
= control target key start
LH: loop header
LB: loop body
LE: loop exit
PB: predicated region body
PF: predicated region fallthrough
CT: control target
= control target key end

     0   :  { %s1889_s0 = inlined_call_operand.vmem [shape: f32[128,784], index: 0, kind: input, shape index: {}]   ;;  %s1890_s1 = inlined_call_operand.vmem [shape: f32[784,1], index: 1, kind: input, shape index: {}]   ;;  %s1891_s2 = inlined_call_operand.<no memory space> [shape: f32[1,1], index: 2, kind: input, shape index: {}]   ;;  %s1892_s3 = inlined_call_operand.hbm [shape: f32[1,1,128], index: 3, kind: output, shape index: {}]  }
   0x1   :  { %v143_v0 = vld [vmem:[%s1890_s1 + $0x78] sm:$0xff]  ;;  %v142_v1 = vld [vmem:[%s1890_s1 + $0x70] sm:$0xff]  ;;  %v141_v4 = vld [vmem:[%s1890_s1 + $0x68] sm:$0xff] }
   0x2   :  { %v1019_v2 = vld [vmem:[%s1890_s1 + $0x178] sm:$0xff]  ;;  %275 = vmatpush.msra.mxu0 %v143_v0  ;;  %909 = vmatpush.msra.mxu3 %v143_v0  ;;  %v1024_v3 = vld [vmem:[%s1890_s1 + $0x170] sm:$0xff]  ;;  %v1038_v6 = vld [vmem:[%s1890_s1 + $0x168] sm:$0xff] }
   0x3   :  { %941 = vmatpush.msra.mxu2 %v1019_v2  ;;  %v1033_v5 = vld [vmem:[%s1890_s1 + $0xf8] sm:$0xff]  ;;  %v1043_v7 = vld [vmem:[%s1890_s1 + $0xf0] sm:$0xff]  ;;  %v140_v8 = vld [vmem:[%s1890_s1 + $0x60] sm:$0xff] }
   0x4   :  { %276 = vmatpush.msra.mxu0 %v142_v1  ;;  %910 = vmatpush.msra.mxu3 %v142_v1  ;;  %v1053_v9 = vld [vmem:[%s1890_s1 + $0x160] sm:$0xff]  ;;  %v1058_v10 = vld [vmem:[%s1890_s1 + $0xe8] sm:$0xff]  ;;  %v139_v11 = vld [vmem:[%s1890_s1 + $0x58] sm:$0xff] }
   0x5   :  { %942 = vmatpush.msra.mxu2 %v1024_v3  ;;  %925 = vmatpush.msra.mxu1 %v1033_v5  ;;  %v1068_v12 = vld [vmem:[%s1890_s1 + $0x158] sm:$0xff]  ;;  %v1073_v13 = vld [vmem:[%s1890_s1 + $0xe0] sm:$0xff]  ;;  %v138_v14 = vld [vmem:[%s1890_s1 + $0x50] sm:$0xff] }
   0x6   :  { %277 = vmatpush.msra.mxu0 %v141_v4  ;;  %911 = vmatpush.msra.mxu3 %v141_v4  ;;  %v1083_v15 = vld [vmem:[%s1890_s1 + $0x150] sm:$0xff]  ;;  %v1088_v16 = vld [vmem:[%s1890_s1 + $0xd8] sm:$0xff]  ;;  %v137_v17 = vld [vmem:[%s1890_s1 + $0x48] sm:$0xff] }
   0x7   :  { %943 = vmatpush.msra.mxu2 %v1038_v6  ;;  %926 = vmatpush.msra.mxu1 %v1043_v7  ;;  %v1098_v18 = vld [vmem:[%s1890_s1 + $0x148] sm:$0xff]  ;;  %v1103_v19 = vld [vmem:[%s1890_s1 + $0xd0] sm:$0xff]  ;;  %v136_v20 = vld [vmem:[%s1890_s1 + $0x40] sm:$0xff] }
   0x8   :  { %278 = vmatpush.msra.mxu0 %v140_v8  ;;  %912 = vmatpush.msra.mxu3 %v140_v8  ;;  %v1113_v21 = vld [vmem:[%s1890_s1 + $0x140] sm:$0xff]  ;;  %v1118_v22 = vld [vmem:[%s1890_s1 + $0xc8] sm:$0xff]  ;;  %v135_v23 = vld [vmem:[%s1890_s1 + $0x38] sm:$0xff] }
   0x9   :  { %944 = vmatpush.msra.mxu2 %v1053_v9  ;;  %927 = vmatpush.msra.mxu1 %v1058_v10  ;;  %v1128_v24 = vld [vmem:[%s1890_s1 + $0x138] sm:$0xff]  ;;  %v1133_v25 = vld [vmem:[%s1890_s1 + $0xc0] sm:$0xff]  ;;  %v134_v26 = vld [vmem:[%s1890_s1 + $0x30] sm:$0xff] }
   0xa   :  { %279 = vmatpush.msra.mxu0 %v139_v11  ;;  %913 = vmatpush.msra.mxu3 %v139_v11  ;;  %v1143_v27 = vld [vmem:[%s1890_s1 + $0x130] sm:$0xff]  ;;  %v1148_v28 = vld [vmem:[%s1890_s1 + $0xb8] sm:$0xff]  ;;  %v133_v29 = vld [vmem:[%s1890_s1 + $0x28] sm:$0xff] }
   0xb   :  { %945 = vmatpush.msra.mxu2 %v1068_v12  ;;  %928 = vmatpush.msra.mxu1 %v1073_v13  ;;  %v1158_v30 = vld [vmem:[%s1890_s1 + $0x128] sm:$0xff]  ;;  %v1163_v31 = vld [vmem:[%s1890_s1 + $0xb0] sm:$0xff]  ;;  %v132_v32 = vld [vmem:[%s1890_s1 + $0x20] sm:$0xff] }
   0xc   :  { %280 = vmatpush.msra.mxu0 %v138_v14  ;;  %914 = vmatpush.msra.mxu3 %v138_v14  ;;  %v1173_v33 = vld [vmem:[%s1890_s1 + $0x120] sm:$0xff]  ;;  %v1178_v34 = vld [vmem:[%s1890_s1 + $0xa8] sm:$0xff]  ;;  %v131_v35 = vld [vmem:[%s1890_s1 + $0x18] sm:$0xff] }
   0xd   :  { %946 = vmatpush.msra.mxu2 %v1083_v15  ;;  %929 = vmatpush.msra.mxu1 %v1088_v16 }
   0xe   :  { %281 = vmatpush.msra.mxu0 %v137_v17  ;;  %915 = vmatpush.msra.mxu3 %v137_v17 }
   0xf   :  { %947 = vmatpush.msra.mxu2 %v1098_v18  ;;  %930 = vmatpush.msra.mxu1 %v1103_v19 }
  0x10   :  { %282 = vmatpush.msra.mxu0 %v136_v20  ;;  %916 = vmatpush.msra.mxu3 %v136_v20 }
  0x11   :  { %948 = vmatpush.msra.mxu2 %v1113_v21  ;;  %931 = vmatpush.msra.mxu1 %v1118_v22 }
  0x12   :  { %283 = vmatpush.msra.mxu0 %v135_v23  ;;  %917 = vmatpush.msra.mxu3 %v135_v23 }
  0x13   :  { %949 = vmatpush.msra.mxu2 %v1128_v24  ;;  %932 = vmatpush.msra.mxu1 %v1133_v25 }
  0x14   :  { %284 = vmatpush.msra.mxu0 %v134_v26  ;;  %918 = vmatpush.msra.mxu3 %v134_v26 }
  0x15   :  { %950 = vmatpush.msra.mxu2 %v1143_v27  ;;  %933 = vmatpush.msra.mxu1 %v1148_v28 }
  0x16   :  { %285 = vmatpush.msra.mxu0 %v133_v29  ;;  %919 = vmatpush.msra.mxu3 %v133_v29 }
  0x17   :  { %951 = vmatpush.msra.mxu2 %v1158_v30  ;;  %934 = vmatpush.msra.mxu1 %v1163_v31 }
  0x18   :  { %9 = vsyncpa [#allocation4], 0  ;;  %286 = vmatpush.msra.mxu0 %v132_v32  ;;  %920 = vmatpush.msra.mxu3 %v132_v32  ;;  %v1188_v36 = vld [vmem:[%s1890_s1 + $0x118] sm:$0xff]  ;;  %v1193_v37 = vld [vmem:[%s1890_s1 + $0xa0] sm:$0xff]  ;;  %vm226_vm0 = vcmask 130048   ;;  %vm817_vm1 = vcmask 130112  }
  0x19   :  { %952 = vmatpush.msra.mxu2 %v1173_v33  ;;  %v130_v38 = vld [vmem:[%s1890_s1 + $0x10] sm:$0xff]  ;;  %935 = vmatpush.msra.mxu1 %v1178_v34  ;;  %v1208_v40 = vld [vmem:[%s1890_s1 + $0x98] sm:$0xff]  ;;  %v129_v41 = vld [vmem:[%s1890_s1 + $0x8] sm:$0xff]  ;;  %vm821_vm2 = vcmask 195712   ;;  %vm825_vm3 = vcmask 261312   ;;  %vm829_vm4 = vcmask 326912  }
  0x1a   :  { %287 = vmatpush.msra.mxu0 %v131_v35  ;;  %921 = vmatpush.msra.mxu3 %v131_v35  ;;  %v1203_v39 = vld [vmem:[%s1890_s1 + $0x110] sm:$0xff]  ;;  %v1218_v42 = vld [vmem:[%s1890_s1 + $0x108] sm:$0xff]  ;;  %v128_v44 = vld [vmem:[%s1890_s1] sm:$0xff]  ;;  %vm833_vm5 = vcmask 392512   ;;  %vm837_vm6 = vcmask 458112   ;;  %vm841_vm7 = vcmask 523712  }
  0x1b   :  { %953 = vmatpush.msra.mxu2 %v1188_v36  ;;  %936 = vmatpush.msra.mxu1 %v1193_v37  ;;  %v1223_v43 = vld [vmem:[%s1890_s1 + $0x90] sm:$0xff]  ;;  %v16_v45 = vld [vmem:[%s1889_s0] sm:$0xff]  ;;  %v191_v47 = vld [vmem:[%s1890_s1 + $0x1f8] sm:$0xff]  ;;  %vm845_vm8 = vcmask 589312   ;;  %vm849_vm9 = vcmask 654912   ;;  %vm853_vm10 = vcmask 720512  }
  0x1c   :  { %288 = vmatpush.msra.mxu0 %v130_v38  ;;  %922 = vmatpush.msra.mxu3 %v130_v38  ;;  %v44_v46 = vld [vmem:[%s1889_s0 + $0xe0] sm:$0xff]  ;;  %v1249_v49 = vld [vmem:[%s1890_s1 + $0x88] sm:$0xff]  ;;  %v46_v50 = vld [vmem:[%s1889_s0 + $0xf0] sm:$0xff]  ;;  %vm857_vm11 = vcmask 786112   ;;  %vm861_vm12 = vcmask 851712   ;;  %vm865_vm13 = vcmask 917312  }
  0x1d   :  { %954 = vmatpush.msra.mxu2 %v1203_v39  ;;  %937 = vmatpush.msra.mxu1 %v1208_v40  ;;  %v1244_v48 = vld [vmem:[%s1890_s1 + $0x100] sm:$0xff]  ;;  %v190_v52 = vld [vmem:[%s1890_s1 + $0x1f0] sm:$0xff]  ;;  %v45_v53 = vld [vmem:[%s1889_s0 + $0xe8] sm:$0xff]  ;;  %vm869_vm14 = vcmask 982912   ;;  %s884_s26 = sshll.u32 %s1892_s3, 4  ;;  %vm873_vm15 = vcmask 1048512   ;;  %s885_s26 = int_to_ptr.hbm [resolvable:$true] %s884_s26 }
  0x1e   :  { %289 = vmatpush.msra.mxu0 %v129_v41  ;;  %923 = vmatpush.msra.mxu3 %v129_v41  ;;  %v1258_v51 = vld [vmem:[%s1890_s1 + $0x80] sm:$0xff]  ;;  %v225_v54 = vld [vmem:[%s1890_s1 + $0x308] sm:$0xff]  ;;  %v223_v55 = vld [vmem:[%s1890_s1 + $0x2f8] sm:$0xff] }
  0x1f   :  { %955 = vmatpush.msra.mxu2 %v1218_v42  ;;  %938 = vmatpush.msra.mxu1 %v1223_v43  ;;  %v189_v56 = vld [vmem:[%s1890_s1 + $0x1e8] sm:$0xff]  ;;  %v23_v57 = vld [vmem:[%s1889_s0 + $0x38] sm:$0xff]  ;;  %v222_v59 = vld [vmem:[%s1890_s1 + $0x2f0] sm:$0xff] }
  0x20   :  { %290 = vmatpush.msra.mxu0 %v128_v44  ;;  %924 = vmatpush.msra.mxu3 %v128_v44  ;;  %v51_v58 = vld [vmem:[%s1889_s0 + $0x118] sm:$0xff]  ;;  %v188_v60 = vld [vmem:[%s1890_s1 + $0x1e0] sm:$0xff]  ;;  %v53_v61 = vld [vmem:[%s1889_s0 + $0x128] sm:$0xff] }
  0x21   :  { %291 = vmatmul.f32.vlgmr.msra.gmra.mxu0 %v16_v45  ;;  %303 = vmatmul.f32.vlgmr.msra.gmra.mxu3 %v44_v46  ;;  %v221_v62 = vld [vmem:[%s1890_s1 + $0x2e8] sm:$0xff]  ;;  %v187_v63 = vld [vmem:[%s1890_s1 + $0x1d8] sm:$0xff]  ;;  %v52_v0 = vld [vmem:[%s1889_s0 + $0x120] sm:$0xff] }
  0x22   :  { %470 = vmatpush.msrb.mxu3 %v191_v47  ;;  %340 = vmatpush.msrb.mxu0 %v1033_v5  ;;  %v220_v1 = vld [vmem:[%s1890_s1 + $0x2e0] sm:$0xff]  ;;  %v186_v4 = vld [vmem:[%s1890_s1 + $0x1d0] sm:$0xff]  ;;  %v219_v8 = vld [vmem:[%s1890_s1 + $0x2d8] sm:$0xff] }
  0x23   :  { %956 = vmatpush.msra.mxu2 %v1244_v48  ;;  %939 = vmatpush.msra.mxu1 %v1249_v49  ;;  %v30_v5 = vld [vmem:[%s1889_s0 + $0x70] sm:$0xff]  ;;  %v60_v11 = vld [vmem:[%s1889_s0 + $0x160] sm:$0xff]  ;;  %v217_v17 = vld [vmem:[%s1890_s1 + $0x2c8] sm:$0xff] }
  0x24   :  { %433 = vmatmul.f32.vlgmr.msra.gmra.mxu2 %v46_v50  ;;  %341 = vmatpush.msrb.mxu0 %v1043_v7  ;;  %v58_v7 = vld [vmem:[%s1889_s0 + $0x150] sm:$0xff]  ;;  %v184_v14 = vld [vmem:[%s1890_s1 + $0x1c0] sm:$0xff]  ;;  %v37_v20 = vld [vmem:[%s1889_s0 + $0xa8] sm:$0xff] }
  0x25   :  { %940 = vmatpush.msra.mxu1 %v1258_v51  ;;  %471 = vmatpush.msrb.mxu3 %v190_v52  ;;  %v224_v23 = vld [vmem:[%s1890_s1 + $0x300] sm:$0xff]  ;;  %v182_v26 = vld [vmem:[%s1890_s1 + $0x1b0] sm:$0xff]  ;;  %v181_v32 = vld [vmem:[%s1890_s1 + $0x1a8] sm:$0xff] }
  0x26   :  { %342 = vmatpush.msrb.mxu0 %v1058_v10  ;;  %368 = vmatmul.f32.vlgmr.msra.gmra.mxu1 %v45_v53  ;;  %v185_v10 = vld [vmem:[%s1890_s1 + $0x1c8] sm:$0xff]  ;;  %v66_v29 = vld [vmem:[%s1889_s0 + $0x190] sm:$0xff]  ;;  %v180_v41 = vld [vmem:[%s1890_s1 + $0x1a0] sm:$0xff] }
  0x27   :  { %679 = vmatpush.msrb.mxu2 %v225_v54  ;;  %600 = vmatpush.msrb.mxu1 %v223_v55  ;;  %v17_v35 = vld [vmem:[%s1889_s0 + $0x8] sm:$0xff]  ;;  %v214_v38 = vld [vmem:[%s1890_s1 + $0x2b0] sm:$0xff]  ;;  %v179_v44 = vld [vmem:[%s1890_s1 + $0x198] sm:$0xff] }
  0x28   :  { %343 = vmatpush.msrb.mxu0 %v1073_v13  ;;  %472 = vmatpush.msrb.mxu3 %v189_v56  ;;  %v218_v13 = vld [vmem:[%s1890_s1 + $0x2d0] sm:$0xff]  ;;  %v80_v45 = vld [vmem:[%s1889_s0 + $0x200] sm:$0xff]  ;;  %v31_v46 = vld [vmem:[%s1889_s0 + $0x78] sm:$0xff] }
  0x29   :  { %294 = vmatmul.f32.gmra.mxu0 %v23_v57  ;;  %306 = vmatmul.f32.gmra.mxu3 %v51_v58  ;;  %v87_v47 = vld [vmem:[%s1889_s0 + $0x238] sm:$0xff]  ;;  %v18_v52 = vld [vmem:[%s1889_s0 + $0x10] sm:$0xff]  ;;  %v208_v55 = vld [vmem:[%s1890_s1 + $0x280] sm:$0xff] }
  0x2a   :  { %344 = vmatpush.msrb.mxu0 %v1088_v16  ;;  %601 = vmatpush.msrb.mxu1 %v222_v59  ;;  %v59_v16 = vld [vmem:[%s1889_s0 + $0x158] sm:$0xff]  ;;  %v206_v54 = vld [vmem:[%s1890_s1 + $0x270] sm:$0xff]  ;;  %v101_v56 = vld [vmem:[%s1889_s0 + $0x2a8] sm:$0xff] }
  0x2b   :  { %473 = vmatpush.msrb.mxu3 %v188_v60  ;;  %680 = vmatpush.msrb.mxu2 %v224_v23  ;;  %v95_v50 = vld [vmem:[%s1889_s0 + $0x278] sm:$0xff]  ;;  %v204_v57 = vld [vmem:[%s1890_s1 + $0x260] sm:$0xff]  ;;  %v25_v59 = vld [vmem:[%s1889_s0 + $0x48] sm:$0xff] }
  0x2c   :  { %436 = vmatmul.f32.gmra.mxu2 %v53_v61  ;;  %345 = vmatpush.msrb.mxu0 %v1103_v19  ;;  %v183_v19 = vld [vmem:[%s1890_s1 + $0x1b8] sm:$0xff]  ;;  %v109_v61 = vld [vmem:[%s1889_s0 + $0x2e8] sm:$0xff]  ;;  %v122_v23 = vld [vmem:[%s1889_s0 + $0x350] sm:$0xff] }
  0x2d   :  { %602 = vmatpush.msrb.mxu1 %v221_v62  ;;  %474 = vmatpush.msrb.mxu3 %v187_v63  ;;  %v207_v53 = vld [vmem:[%s1890_s1 + $0x278] sm:$0xff]  ;;  %v202_v62 = vld [vmem:[%s1890_s1 + $0x250] sm:$0xff]  ;;  %v108_v63 = vld [vmem:[%s1889_s0 + $0x2e0] sm:$0xff] }
  0x2e   :  { %346 = vmatpush.msrb.mxu0 %v1118_v22  ;;  %371 = vmatmul.f32.gmra.mxu1 %v52_v0  ;;  %v65_v22 = vld [vmem:[%s1889_s0 + $0x188] sm:$0xff]  ;;  %v107_v58 = vld [vmem:[%s1889_s0 + $0x2d8] sm:$0xff] }
  0x2f   :  { %603 = vmatpush.msrb.mxu1 %v220_v1  ;;  %475 = vmatpush.msrb.mxu3 %v186_v4  ;;  %v203_v60 = vld [vmem:[%s1890_s1 + $0x258] sm:$0xff]  ;;  %v201_v0 = vld [vmem:[%s1890_s1 + $0x248] sm:$0xff]  ;;  %v200_v1 = vld [vmem:[%s1890_s1 + $0x240] sm:$0xff] }
  0x30   :  { %347 = vmatpush.msrb.mxu0 %v1133_v25  ;;  %v216_v25 = vld [vmem:[%s1890_s1 + $0x2c0] sm:$0xff]  ;;  %v114_v4 = vld [vmem:[%s1889_s0 + $0x310] sm:$0xff] }
  0x31   :  { %297 = vmatmul.f32.gmra.mxu0 %v30_v5  ;;  %309 = vmatmul.f32.gmra.mxu3 %v58_v7  ;;  %v32_v5 = vld [vmem:[%s1889_s0 + $0x80] sm:$0xff]  ;;  %v199_v7 = vld [vmem:[%s1890_s1 + $0x238] sm:$0xff] }
  0x32   :  { %348 = vmatpush.msrb.mxu0 %v1148_v28  ;;  %604 = vmatpush.msrb.mxu1 %v219_v8  ;;  %v67_v28 = vld [vmem:[%s1889_s0 + $0x198] sm:$0xff]  ;;  %v116_v8 = vld [vmem:[%s1889_s0 + $0x320] sm:$0xff] }
  0x33   :  { %476 = vmatpush.msrb.mxu3 %v185_v10  ;;  %v198_v10 = vld [vmem:[%s1890_s1 + $0x230] sm:$0xff] }
  0x34   :  { %439 = vmatmul.f32.gmra.mxu2 %v60_v11  ;;  %349 = vmatpush.msrb.mxu0 %v1163_v31  ;;  %v215_v31 = vld [vmem:[%s1890_s1 + $0x2b8] sm:$0xff] }
  0x35   :  { %605 = vmatpush.msrb.mxu1 %v218_v13  ;;  %477 = vmatpush.msrb.mxu3 %v184_v14  ;;  %v115_v11 = vld [vmem:[%s1889_s0 + $0x318] sm:$0xff]  ;;  %v197_v13 = vld [vmem:[%s1890_s1 + $0x228] sm:$0xff]  ;;  %v196_v14 = vld [vmem:[%s1890_s1 + $0x220] sm:$0xff] }
  0x36   :  { %350 = vmatpush.msrb.mxu0 %v1178_v34  ;;  %374 = vmatmul.f32.gmra.mxu1 %v59_v16  ;;  %v72_v34 = vld [vmem:[%s1889_s0 + $0x1c0] sm:$0xff]  ;;  %v121_v16 = vld [vmem:[%s1889_s0 + $0x348] sm:$0xff] }
  0x37   :  { %606 = vmatpush.msrb.mxu1 %v217_v17  ;;  %478 = vmatpush.msrb.mxu3 %v183_v19  ;;  %v39_v17 = vld [vmem:[%s1889_s0 + $0xb8] sm:$0xff] }
  0x38   :  { %351 = vmatpush.msrb.mxu0 %v1193_v37  ;;  %v74_v37 = vld [vmem:[%s1889_s0 + $0x1d0] sm:$0xff]  ;;  %v195_v19 = vld [vmem:[%s1890_s1 + $0x218] sm:$0xff] }
  0x39   :  { %300 = vmatmul.f32.gmra.mxu0 %v37_v20  ;;  %312 = vmatmul.f32.gmra.mxu3 %v65_v22  ;;  %v123_v20 = vld [vmem:[%s1889_s0 + $0x358] sm:$0xff]  ;;  %v194_v22 = vld [vmem:[%s1890_s1 + $0x210] sm:$0xff] }
  0x3a   :  { %352 = vmatpush.msrb.mxu0 %v1208_v40  ;;  %607 = vmatpush.msrb.mxu1 %v216_v25  ;;  %v73_v40 = vld [vmem:[%s1889_s0 + $0x1c8] sm:$0xff] }
  0x3b   :  { %479 = vmatpush.msrb.mxu3 %v182_v26  ;;  %v193_v25 = vld [vmem:[%s1890_s1 + $0x208] sm:$0xff]  ;;  %v192_v26 = vld [vmem:[%s1890_s1 + $0x200] sm:$0xff] }
  0x3c   :  { %442 = vmatmul.f32.gmra.mxu2 %v67_v28  ;;  %353 = vmatpush.msrb.mxu0 %v1223_v43  ;;  %v24_v43 = vld [vmem:[%s1889_s0 + $0x40] sm:$0xff]  ;;  %v19_v28 = vld [vmem:[%s1889_s0 + $0x18] sm:$0xff] }
  0x3d   :  { %608 = vmatpush.msrb.mxu1 %v215_v31  ;;  %480 = vmatpush.msrb.mxu3 %v181_v32  ;;  %v22_v31 = vld [vmem:[%s1889_s0 + $0x30] sm:$0xff]  ;;  %v21_v32 = vld [vmem:[%s1889_s0 + $0x28] sm:$0xff] }
  0x3e   :  { %354 = vmatpush.msrb.mxu0 %v1249_v49  ;;  %377 = vmatmul.f32.gmra.mxu1 %v66_v29  ;;  %v211_v49 = vld [vmem:[%s1890_s1 + $0x298] sm:$0xff]  ;;  %v20_v29 = vld [vmem:[%s1889_s0 + $0x20] sm:$0xff] }
  0x3f   :  { %609 = vmatpush.msrb.mxu1 %v214_v38  ;;  %481 = vmatpush.msrb.mxu3 %v180_v41  ;;  %v28_v38 = vld [vmem:[%s1889_s0 + $0x60] sm:$0xff]  ;;  %v34_v41 = vld [vmem:[%s1889_s0 + $0x90] sm:$0xff] }
  0x40   :  { %355 = vmatpush.msrb.mxu0 %v1258_v51  ;;  %v94_v51 = vld [vmem:[%s1889_s0 + $0x270] sm:$0xff] }
  0x41   :  { %315 = vmatmul.f32.gmra.mxu3 %v72_v34  ;;  %356 = vmatmul.f32.vlgmr.msrb.gmra.mxu0 %v17_v35  ;;  %v26_v34 = vld [vmem:[%s1889_s0 + $0x50] sm:$0xff]  ;;  %v27_v35 = vld [vmem:[%s1889_s0 + $0x58] sm:$0xff] }
  0x42   :  { %405 = vmatpush.msra.mxu0 %v1019_v2  ;;  %v79_v2 = vld [vmem:[%s1889_s0 + $0x1f8] sm:$0xff]  ;;  %482 = vmatpush.msrb.mxu3 %v179_v44 }
  0x43   :  { %v43_v44 = vld [vmem:[%s1889_s0 + $0xd8] sm:$0xff] }
  0x44   :  { %445 = vmatmul.f32.gmra.mxu2 %v74_v37  ;;  %406 = vmatpush.msra.mxu0 %v1024_v3  ;;  %v213_v3 = vld [vmem:[%s1890_s1 + $0x2a8] sm:$0xff] }
  0x45   :  { %610 = vmatpush.msrb.mxu1 %v213_v3  ;;  %v29_v37 = vld [vmem:[%s1889_s0 + $0x68] sm:$0xff]  ;;  %v40_v3 = vld [vmem:[%s1889_s0 + $0xc0] sm:$0xff] }
  0x46   :  { %407 = vmatpush.msra.mxu0 %v1038_v6  ;;  %380 = vmatmul.f32.gmra.mxu1 %v73_v40  ;;  %v81_v6 = vld [vmem:[%s1889_s0 + $0x208] sm:$0xff] }
  0x47   :  { %v33_v40 = vld [vmem:[%s1889_s0 + $0x88] sm:$0xff] }
  0x48   :  { %408 = vmatpush.msra.mxu0 %v1053_v9  ;;  %v212_v9 = vld [vmem:[%s1890_s1 + $0x2a0] sm:$0xff] }
  0x49   :  { %318 = vmatmul.f32.gmra.mxu3 %v79_v2  ;;  %359 = vmatmul.f32.gmra.mxu0 %v24_v43  ;;  %v36_v2 = vld [vmem:[%s1889_s0 + $0xa0] sm:$0xff]  ;;  %v35_v43 = vld [vmem:[%s1889_s0 + $0x98] sm:$0xff] }
  0x4a   :  { %409 = vmatpush.msra.mxu0 %v1068_v12  ;;  %611 = vmatpush.msrb.mxu1 %v212_v9  ;;  %v86_v12 = vld [vmem:[%s1889_s0 + $0x230] sm:$0xff] }
  0x4c   :  { %448 = vmatmul.f32.gmra.mxu2 %v81_v6  ;;  %410 = vmatpush.msra.mxu0 %v1083_v15  ;;  %v178_v15 = vld [vmem:[%s1890_s1 + $0x190] sm:$0xff]  ;;  %v41_v6 = vld [vmem:[%s1889_s0 + $0xc8] sm:$0xff] }
  0x4d   :  { %483 = vmatpush.msrb.mxu3 %v178_v15  ;;  %612 = vmatpush.msrb.mxu1 %v211_v49  ;;  %v50_v15 = vld [vmem:[%s1889_s0 + $0x110] sm:$0xff] }
  0x4e   :  { %411 = vmatpush.msra.mxu0 %v1098_v18  ;;  %383 = vmatmul.f32.gmra.mxu1 %v80_v45  ;;  %v88_v18 = vld [vmem:[%s1889_s0 + $0x240] sm:$0xff]  ;;  %v42_v45 = vld [vmem:[%s1889_s0 + $0xd0] sm:$0xff] }
  0x50   :  { %412 = vmatpush.msra.mxu0 %v1113_v21  ;;  %v177_v21 = vld [vmem:[%s1890_s1 + $0x188] sm:$0xff] }
  0x51   :  { %321 = vmatmul.f32.gmra.mxu3 %v86_v12  ;;  %362 = vmatmul.f32.gmra.mxu0 %v31_v46  ;;  %v47_v12 = vld [vmem:[%s1889_s0 + $0xf8] sm:$0xff]  ;;  %v48_v46 = vld [vmem:[%s1889_s0 + $0x100] sm:$0xff] }
  0x52   :  { %413 = vmatpush.msra.mxu0 %v1128_v24  ;;  %484 = vmatpush.msrb.mxu3 %v177_v21  ;;  %v93_v24 = vld [vmem:[%s1889_s0 + $0x268] sm:$0xff] }
  0x54   :  { %451 = vmatmul.f32.gmra.mxu2 %v88_v18  ;;  %414 = vmatpush.msra.mxu0 %v1143_v27  ;;  %v38_v27 = vld [vmem:[%s1889_s0 + $0xb0] sm:$0xff] }
  0x56   :  { %415 = vmatpush.msra.mxu0 %v1158_v30  ;;  %386 = vmatmul.f32.gmra.mxu1 %v87_v47  ;;  %v210_v30 = vld [vmem:[%s1890_s1 + $0x290] sm:$0xff]  ;;  %v49_v47 = vld [vmem:[%s1889_s0 + $0x108] sm:$0xff] }
  0x57   :  { %613 = vmatpush.msrb.mxu1 %v210_v30 }
  0x58   :  { %416 = vmatpush.msra.mxu0 %v1173_v33  ;;  %v176_v33 = vld [vmem:[%s1890_s1 + $0x180] sm:$0xff] }
  0x59   :  { %324 = vmatmul.f32.gmra.mxu3 %v93_v24  ;;  %365 = vmatmul.f32.gmra.mxu0 %v38_v27  ;;  %v54_v27 = vld [vmem:[%s1889_s0 + $0x130] sm:$0xff] }
  0x5a   :  { %417 = vmatpush.msra.mxu0 %v1188_v36  ;;  %485 = vmatpush.msrb.mxu3 %v176_v33  ;;  %v100_v36 = vld [vmem:[%s1889_s0 + $0x2a0] sm:$0xff]  ;;  %v57_v33 = vld [vmem:[%s1889_s0 + $0x148] sm:$0xff] }
  0x5c   :  { %454 = vmatmul.f32.gmra.mxu2 %v95_v50  ;;  %418 = vmatpush.msra.mxu0 %v1203_v39  ;;  %v209_v39 = vld [vmem:[%s1890_s1 + $0x288] sm:$0xff]  ;;  %v55_v50 = vld [vmem:[%s1889_s0 + $0x138] sm:$0xff] }
  0x5d   :  { %614 = vmatpush.msrb.mxu1 %v209_v39 }
  0x5e   :  { %419 = vmatpush.msra.mxu0 %v1218_v42  ;;  %389 = vmatmul.f32.gmra.mxu1 %v94_v51  ;;  %v102_v42 = vld [vmem:[%s1889_s0 + $0x2b0] sm:$0xff] }
  0x5f   :  { %615 = vmatpush.msrb.mxu1 %v208_v55  ;;  %v62_v55 = vld [vmem:[%s1889_s0 + $0x170] sm:$0xff] }
  0x60   :  { %420 = vmatpush.msra.mxu0 %v1244_v48  ;;  %v205_v48 = vld [vmem:[%s1890_s1 + $0x268] sm:$0xff] }
  0x61   :  { %327 = vmatmul.f32.gmra.mxu3 %v100_v36  ;;  %421 = vmatmul.f32.vlgmr.msra.gmra.mxu0 %v18_v52  ;;  %v56_v52 = vld [vmem:[%s1889_s0 + $0x140] sm:$0xff] }
  0x62   :  { %535 = vmatpush.msrb.mxu0 %v207_v53 }
  0x64   :  { %457 = vmatmul.f32.gmra.mxu2 %v102_v42  ;;  %536 = vmatpush.msrb.mxu0 %v206_v54  ;;  %v61_v54 = vld [vmem:[%s1889_s0 + $0x168] sm:$0xff] }
  0x66   :  { %392 = vmatmul.f32.gmra.mxu1 %v101_v56  ;;  %537 = vmatpush.msrb.mxu0 %v205_v48 }
  0x68   :  { %538 = vmatpush.msrb.mxu0 %v204_v57  ;;  %v64_v57 = vld [vmem:[%s1889_s0 + $0x180] sm:$0xff] }
  0x69   :  { %330 = vmatmul.f32.gmra.mxu3 %v107_v58  ;;  %424 = vmatmul.f32.gmra.mxu0 %v25_v59  ;;  %v63_v59 = vld [vmem:[%s1889_s0 + $0x178] sm:$0xff] }
  0x6a   :  { %539 = vmatpush.msrb.mxu0 %v203_v60 }
  0x6c   :  { %460 = vmatmul.f32.gmra.mxu2 %v109_v61  ;;  %540 = vmatpush.msrb.mxu0 %v202_v62 }
  0x6e   :  { %395 = vmatmul.f32.gmra.mxu1 %v108_v63  ;;  %541 = vmatpush.msrb.mxu0 %v201_v0  ;;  %v68_v63 = vld [vmem:[%s1889_s0 + $0x1a0] sm:$0xff]  ;;  %v69_v0 = vld [vmem:[%s1889_s0 + $0x1a8] sm:$0xff] }
  0x70   :  { %542 = vmatpush.msrb.mxu0 %v200_v1 }
  0x71   :  { %333 = vmatmul.f32.gmra.mxu3 %v114_v4  ;;  %427 = vmatmul.f32.gmra.mxu0 %v32_v5  ;;  %v71_v5 = vld [vmem:[%s1889_s0 + $0x1b8] sm:$0xff] }
  0x72   :  { %543 = vmatpush.msrb.mxu0 %v199_v7 }
  0x74   :  { %463 = vmatmul.f32.gmra.mxu2 %v116_v8  ;;  %544 = vmatpush.msrb.mxu0 %v198_v10  ;;  %v70_v8 = vld [vmem:[%s1889_s0 + $0x1b0] sm:$0xff] }
  0x76   :  { %398 = vmatmul.f32.gmra.mxu1 %v115_v11  ;;  %545 = vmatpush.msrb.mxu0 %v197_v13 }
  0x78   :  { %546 = vmatpush.msrb.mxu0 %v196_v14  ;;  %v75_v14 = vld [vmem:[%s1889_s0 + $0x1d8] sm:$0xff] }
  0x79   :  { %336 = vmatmul.f32.gmra.mxu3 %v121_v16  ;;  %430 = vmatmul.f32.gmra.mxu0 %v39_v17  ;;  %v76_v16 = vld [vmem:[%s1889_s0 + $0x1e0] sm:$0xff] }
  0x7a   :  { %547 = vmatpush.msrb.mxu0 %v195_v19 }
  0x7c   :  { %466 = vmatmul.f32.gmra.mxu2 %v123_v20  ;;  %548 = vmatpush.msrb.mxu0 %v194_v22  ;;  %v78_v20 = vld [vmem:[%s1889_s0 + $0x1f0] sm:$0xff] }
  0x7e   :  { %401 = vmatmul.f32.gmra.mxu1 %v122_v23  ;;  %549 = vmatpush.msrb.mxu0 %v193_v25  ;;  %v77_v23 = vld [vmem:[%s1889_s0 + $0x1e8] sm:$0xff] }
  0x80   :  { %550 = vmatpush.msrb.mxu0 %v192_v26 }
  0x81   :  { %486 = vmatmul.f32.vlgmr.msrb.gmra.mxu3 %v19_v28  ;;  %551 = vmatmul.f32.vlgmr.msrb.gmra.mxu0 %v20_v29  ;;  %v82_v29 = vld [vmem:[%s1889_s0 + $0x210] sm:$0xff] }
  0x84   :  { %893 = vmatmul.msk.f32.vlgmr.msrb.gmra.mxu2 %vm226_vm0, %v22_v31  ;;  %v83_v31 = vld [vmem:[%s1889_s0 + $0x218] sm:$0xff] }
  0x86   :  { %616 = vmatmul.f32.vlgmr.msrb.gmra.mxu1 %v21_v32 }
  0x89   :  { %489 = vmatmul.f32.gmra.mxu3 %v26_v34  ;;  %554 = vmatmul.f32.gmra.mxu0 %v27_v35  ;;  %v85_v35 = vld [vmem:[%s1889_s0 + $0x228] sm:$0xff] }
  0x8c   :  { %894 = vmatmul.msk.f32.gmra.mxu2 %vm226_vm0, %v29_v37 }
  0x8e   :  { %619 = vmatmul.f32.gmra.mxu1 %v28_v38  ;;  %v84_v38 = vld [vmem:[%s1889_s0 + $0x220] sm:$0xff] }
  0x91   :  { %492 = vmatmul.f32.gmra.mxu3 %v33_v40  ;;  %557 = vmatmul.f32.gmra.mxu0 %v34_v41 }
  0x94   :  { %895 = vmatmul.msk.f32.gmra.mxu2 %vm226_vm0, %v36_v2 }
  0x96   :  { %622 = vmatmul.f32.gmra.mxu1 %v35_v43  ;;  %v89_v43 = vld [vmem:[%s1889_s0 + $0x248] sm:$0xff] }
  0x99   :  { %495 = vmatmul.f32.gmra.mxu3 %v40_v3  ;;  %560 = vmatmul.f32.gmra.mxu0 %v41_v6  ;;  %v90_v3 = vld [vmem:[%s1889_s0 + $0x250] sm:$0xff] }
  0x9c   :  { %896 = vmatmul.msk.f32.gmra.mxu2 %vm226_vm0, %v43_v44 }
  0x9e   :  { %v1628_v9 = vpop.f32.mrf.mxu0  ;;  %625 = vmatmul.f32.gmra.mxu1 %v42_v45  ;;  %v92_v45 = vld [vmem:[%s1889_s0 + $0x260] sm:$0xff] }
  0xa1   :  { %498 = vmatmul.f32.gmra.mxu3 %v47_v12  ;;  %563 = vmatmul.f32.gmra.mxu0 %v48_v46  ;;  %v91_v46 = vld [vmem:[%s1889_s0 + $0x258] sm:$0xff] }
  0xa3   :  { %v369_v18 = vpop.f32.mrf.mxu1 }
  0xa4   :  { %v304_v49 = vpop.f32.mrf.mxu3  ;;  %897 = vmatmul.msk.f32.gmra.mxu2 %vm226_vm0, %v50_v15 }
  0xa5   :  { %v370_v21 = vadd.f32 %v369_v18, %v304_v49  ;;  %v96_v49 = vld [vmem:[%s1889_s0 + $0x280] sm:$0xff] }
  0xa6   :  { %v1643_v24 = vpop.f32.mrf.mxu0  ;;  %628 = vmatmul.f32.gmra.mxu1 %v49_v47 }
  0xa7   :  { %v434_v30 = vpop.f32.mrf.mxu2 }
  0xa8   :  { %v1651_v51 = vadd.f32 %v434_v30, %v370_v21  ;;  %v97_v21 = vld [vmem:[%s1889_s0 + $0x288] sm:$0xff]  ;;  %v99_v30 = vld [vmem:[%s1889_s0 + $0x298] sm:$0xff] }
  0xa9   :  { %501 = vmatmul.f32.gmra.mxu3 %v54_v27  ;;  %566 = vmatmul.f32.gmra.mxu0 %v55_v50 }
  0xab   :  { %v372_v36 = vpop.f32.mrf.mxu1 }
  0xac   :  { %v307_v39 = vpop.f32.mrf.mxu3  ;;  %898 = vmatmul.msk.f32.gmra.mxu2 %vm226_vm0, %v57_v33 }
  0xad   :  { %v373_v53 = vadd.f32 %v372_v36, %v307_v39  ;;  %v98_v36 = vld [vmem:[%s1889_s0 + $0x290] sm:$0xff] }
  0xae   :  { %v1660_v42 = vpop.f32.mrf.mxu0  ;;  %631 = vmatmul.f32.gmra.mxu1 %v56_v52 }
  0xaf   :  { %v437_v56 = vpop.f32.mrf.mxu2 }
  0xb0   :  { %v1668_v48 = vadd.f32 %v437_v56, %v373_v53 }
  0xb1   :  { %504 = vmatmul.f32.gmra.mxu3 %v61_v54  ;;  %569 = vmatmul.f32.gmra.mxu0 %v62_v55  ;;  %v103_v54 = vld [vmem:[%s1889_s0 + $0x2b8] sm:$0xff]  ;;  %v104_v55 = vld [vmem:[%s1889_s0 + $0x2c0] sm:$0xff] }
  0xb3   :  { %v375_v58 = vpop.f32.mrf.mxu1 }
  0xb4   :  { %v310_v60 = vpop.f32.mrf.mxu3  ;;  %899 = vmatmul.msk.f32.gmra.mxu2 %vm226_vm0, %v64_v57 }
  0xb5   :  { %v376_v61 = vadd.f32 %v375_v58, %v310_v60  ;;  %v106_v58 = vld [vmem:[%s1889_s0 + $0x2d0] sm:$0xff]  ;;  %v105_v60 = vld [vmem:[%s1889_s0 + $0x2c8] sm:$0xff] }
  0xb6   :  { %v1677_v62 = vpop.f32.mrf.mxu0  ;;  %634 = vmatmul.f32.gmra.mxu1 %v63_v59 }
  0xb7   :  { %v440_v1 = vpop.f32.mrf.mxu2 }
  0xb8   :  { %v1685_v4 = vadd.f32 %v440_v1, %v376_v61  ;;  %v110_v1 = vld [vmem:[%s1889_s0 + $0x2f0] sm:$0xff] }
  0xb9   :  { %507 = vmatmul.f32.gmra.mxu3 %v68_v63  ;;  %572 = vmatmul.f32.gmra.mxu0 %v69_v0 }
  0xbb   :  { %v378_v7 = vpop.f32.mrf.mxu1 }
  0xbc   :  { %v313_v10 = vpop.f32.mrf.mxu3  ;;  %900 = vmatmul.msk.f32.gmra.mxu2 %vm226_vm0, %v71_v5  ;;  %v111_v5 = vld [vmem:[%s1889_s0 + $0x2f8] sm:$0xff] }
  0xbd   :  { %v379_v11 = vadd.f32 %v378_v7, %v313_v10  ;;  %v113_v10 = vld [vmem:[%s1889_s0 + $0x308] sm:$0xff] }
  0xbe   :  { %v1694_v13 = vpop.f32.mrf.mxu0  ;;  %637 = vmatmul.f32.gmra.mxu1 %v70_v8 }
  0xbf   :  { %v443_v17 = vpop.f32.mrf.mxu2 }
  0xc0   :  { %v1702_v19 = vadd.f32 %v443_v17, %v379_v11 }
  0xc1   :  { %510 = vmatmul.f32.gmra.mxu3 %v75_v14  ;;  %575 = vmatmul.f32.gmra.mxu0 %v76_v16  ;;  %v112_v14 = vld [vmem:[%s1889_s0 + $0x300] sm:$0xff] }
  0xc3   :  { %v381_v22 = vpop.f32.mrf.mxu1 }
  0xc4   :  { %v316_v25 = vpop.f32.mrf.mxu3  ;;  %901 = vmatmul.msk.f32.gmra.mxu2 %vm226_vm0, %v78_v20 }
  0xc5   :  { %v382_v26 = vadd.f32 %v381_v22, %v316_v25  ;;  %v117_v22 = vld [vmem:[%s1889_s0 + $0x328] sm:$0xff]  ;;  %v988_v25 = vmov 0  }
  0xc6   :  { %v1711_v28 = vpop.f32.mrf.mxu0  ;;  %640 = vmatmul.f32.gmra.mxu1 %v77_v23  ;;  %v118_v23 = vld [vmem:[%s1889_s0 + $0x330] sm:$0xff]  ;;  %959 = vset.pattern.permute.xlu0 %v988_v25 }
  0xc7   :  { %v446_v32 = vpop.f32.mrf.mxu2  ;;  %960 = vset.pattern.permute.xlu1 %v988_v25  ;;  %961 = vset.pattern.permute.xlu2 %v988_v25 }
  0xc8   :  { %v1719_v34 = vadd.f32 %v446_v32, %v382_v26 }
  0xc9   :  { %513 = vmatmul.f32.gmra.mxu3 %v82_v29  ;;  %578 = vmatmul.f32.gmra.mxu0 %v83_v31  ;;  %v120_v31 = vld [vmem:[%s1889_s0 + $0x340] sm:$0xff] }
  0xcb   :  { %v384_v37 = vpop.f32.mrf.mxu1 }
  0xcc   :  { %v319_v40 = vpop.f32.mrf.mxu3  ;;  %902 = vmatmul.msk.f32.gmra.mxu2 %vm226_vm0, %v85_v35  ;;  %v119_v35 = vld [vmem:[%s1889_s0 + $0x338] sm:$0xff] }
  0xcd   :  { %v385_v41 = vadd.f32 %v384_v37, %v319_v40 }
  0xce   :  { %v1728_v2 = vpop.f32.mrf.mxu0  ;;  %643 = vmatmul.f32.gmra.mxu1 %v84_v38 }
  0xcf   :  { %v449_v6 = vpop.f32.mrf.mxu2 }
  0xd0   :  { %v1736_v44 = vadd.f32 %v449_v6, %v385_v41  ;;  %v124_v41 = vld [vmem:[%s1889_s0 + $0x360] sm:$0xff] }
  0xd1   :  { %516 = vmatmul.f32.gmra.mxu3 %v89_v43  ;;  %581 = vmatmul.f32.gmra.mxu0 %v90_v3  ;;  %v125_v43 = vld [vmem:[%s1889_s0 + $0x368] sm:$0xff] }
  0xd3   :  { %v387_v12 = vpop.f32.mrf.mxu1 }
  0xd4   :  { %v322_v15 = vpop.f32.mrf.mxu3  ;;  %903 = vmatmul.msk.f32.gmra.mxu2 %vm226_vm0, %v92_v45  ;;  %v127_v45 = vld [vmem:[%s1889_s0 + $0x378] sm:$0xff] }
  0xd5   :  { %v388_v18 = vadd.f32 %v387_v12, %v322_v15 }
  0xd6   :  { %v1745_v47 = vpop.f32.mrf.mxu0  ;;  %646 = vmatmul.f32.gmra.mxu1 %v91_v46  ;;  %v126_v46 = vld [vmem:[%s1889_s0 + $0x370] sm:$0xff] }
  0xd7   :  { %v452_v27 = vpop.f32.mrf.mxu2 }
  0xd8   :  { %v1753_v50 = vadd.f32 %v452_v27, %v388_v18 }
  0xd9   :  { %519 = vmatmul.f32.gmra.mxu3 %v96_v49  ;;  %584 = vmatmul.f32.gmra.mxu0 %v97_v21 }
  0xdb   :  { %v390_v33 = vpop.f32.mrf.mxu1 }
  0xdc   :  { %v325_v52 = vpop.f32.mrf.mxu3  ;;  %904 = vmatmul.msk.f32.gmra.mxu2 %vm226_vm0, %v99_v30  ;;  %v358_v30 = vadd.f32 %v1694_v13, %v1628_v9 }
  0xdd   :  { %v391_v39 = vadd.f32 %v390_v33, %v325_v52 }
  0xde   :  { %v1762_v53 = vpop.f32.mrf.mxu0  ;;  %649 = vmatmul.f32.gmra.mxu1 %v98_v36 }
  0xdf   :  { %v455_v56 = vpop.f32.mrf.mxu2  ;;  %v423_v33 = vadd.f32 %v1762_v53, %v358_v30 }
  0xe0   :  { %v1770_v57 = vadd.f32 %v455_v56, %v391_v39 }
  0xe1   :  { %522 = vmatmul.f32.gmra.mxu3 %v103_v54  ;;  %587 = vmatmul.f32.gmra.mxu0 %v104_v55 }
  0xe3   :  { %v393_v59 = vpop.f32.mrf.mxu1 }
  0xe4   :  { %v328_v61 = vpop.f32.mrf.mxu3  ;;  %905 = vmatmul.msk.f32.gmra.mxu2 %vm226_vm0, %v106_v58  ;;  %v361_v58 = vadd.f32 %v1711_v28, %v1643_v24  ;;  %v364_v24 = vadd.f32 %v1728_v2, %v1660_v42 }
  0xe5   :  { %v394_v63 = vadd.f32 %v393_v59, %v328_v61 }
  0xe6   :  { %v425_v0 = vpop.f32.mrf.mxu0  ;;  %652 = vmatmul.f32.gmra.mxu1 %v105_v60  ;;  %v1834_v60 = vstv %s1891_s2  ;;  %s989_s2 = smov [#allocation3]  }
  0xe7   :  { %v458_v7 = vpop.f32.mrf.mxu2  ;;  %v426_v61 = vadd.f32 %v425_v0, %v361_v58  ;;  %s882_s23 = sshll.u32 %s989_s2, 4  ;;  %s883_s23 = int_to_ptr.vmem [resolvable:$true] %s882_s23 }
  0xe8   :  { %v1785_v8 = vadd.f32 %v458_v7, %v394_v63 }
  0xe9   :  { %525 = vmatmul.f32.gmra.mxu3 %v110_v1  ;;  %590 = vmatmul.f32.gmra.mxu0 %v111_v5 }
  0xeb   :  { %v396_v11 = vpop.f32.mrf.mxu1 }
  0xec   :  { %v331_v16 = vpop.f32.mrf.mxu3  ;;  %906 = vmatmul.msk.f32.gmra.mxu2 %vm226_vm0, %v113_v10 }
  0xed   :  { %v397_v17 = vadd.f32 %v396_v11, %v331_v16 }
  0xee   :  { %v428_v20 = vpop.f32.mrf.mxu0  ;;  %655 = vmatmul.f32.gmra.mxu1 %v112_v14 }
  0xef   :  { %v461_v26 = vpop.f32.mrf.mxu2  ;;  %v429_v11 = vadd.f32 %v428_v20, %v364_v24 }
  0xf0   :  { %v1800_v29 = vadd.f32 %v461_v26, %v397_v17 }
  0xf1   :  { %528 = vmatmul.f32.gmra.mxu3 %v117_v22  ;;  %593 = vmatmul.f32.gmra.mxu0 %v118_v23 }
  0xf3   :  { %v399_v32 = vpop.f32.mrf.mxu1 }
  0xf4   :  { %v334_v37 = vpop.f32.mrf.mxu3  ;;  %907 = vmatmul.msk.f32.gmra.mxu2 %vm226_vm0, %v120_v31  ;;  %v367_v31 = vadd.f32 %v1745_v47, %v1677_v62 }
  0xf5   :  { %v400_v38 = vadd.f32 %v399_v32, %v334_v37 }
  0xf6   :  { %v431_v40 = vpop.f32.mrf.mxu0  ;;  %658 = vmatmul.f32.gmra.mxu1 %v119_v35 }
  0xf7   :  { %v464_v3 = vpop.f32.mrf.mxu2  ;;  %v432_v35 = vadd.f32 %v431_v40, %v367_v31 }
  0xf8   :  { %v1815_v6 = vadd.f32 %v464_v3, %v400_v38 }
  0xf9   :  { %531 = vmatmul.f32.gmra.mxu3 %v124_v41  ;;  %596 = vmatmul.f32.gmra.mxu0 %v125_v43 }
  0xfb   :  { %v402_v12 = vpop.f32.mrf.mxu1 }
  0xfc   :  { %v337_v15 = vpop.f32.mrf.mxu3  ;;  %908 = vmatmul.msk.f32.gmra.mxu2 %vm226_vm0, %v127_v45 }
  0xfd   :  { %v403_v18 = vadd.f32 %v402_v12, %v337_v15 }
  0xfe   :  { %661 = vmatmul.f32.gmra.mxu1 %v126_v46  ;;  %v552_v49 = vpop.f32.mrf.mxu0 }
  0xff   :  { %v467_v21 = vpop.f32.mrf.mxu2 }
 0x100   :  { %v1824_v27 = vadd.f32 %v467_v21, %v403_v18 }
 0x103   :  { %v617_v36 = vpop.f32.mrf.mxu1 }
 0x104   :  { %v487_v52 = vpop.f32.mrf.mxu3 }
 0x105   :  { %v488_v39 = vadd.f32 %v487_v52, %v423_v33 }
 0x106   :  { %v555_v54 = vpop.f32.mrf.mxu0 }
 0x107   :  { %v553_v55 = vadd.f32 %v552_v49, %v488_v39  ;;  %v682_v56 = vpop.f32.mrf.mxu2 }
 0x109   :  { %v618_v59 = vadd.f32 %v617_v36, %v553_v55 }
 0x10b   :  { %v683_v63 = vadd.f32 %v682_v56, %v618_v59  ;;  %v620_v9 = vpop.f32.mrf.mxu1 }
 0x10c   :  { %v490_v13 = vpop.f32.mrf.mxu3 }
 0x10d   :  { %v491_v53 = vadd.f32 %v490_v13, %v426_v61  ;;  %v732_v1 = vadd.f32 %v1834_v60, %v683_v63 }
 0x10e   :  { %v558_v5 = vpop.f32.mrf.mxu0 }
 0x10f   :  { %v556_v7 = vadd.f32 %v555_v54, %v491_v53  ;;  %765 = vperm.xlu0 %959, %v732_v1   ;;  %v685_v10 = vpop.f32.mrf.mxu2 }
 0x111   :  { %v621_v28 = vadd.f32 %v620_v9, %v556_v7 }
 0x113   :  { %v686_v14 = vadd.f32 %v685_v10, %v621_v28  ;;  %v623_v16 = vpop.f32.mrf.mxu1 }
 0x114   :  { %v493_v17 = vpop.f32.mrf.mxu3 }
 0x115   :  { %v733_v0 = vadd.f32 %v1834_v60, %v686_v14  ;;  %v494_v22 = vadd.f32 %v493_v17, %v429_v11 }
 0x116   :  { %v561_v23 = vpop.f32.mrf.mxu0 }
 0x117   :  { %v559_v25 = vadd.f32 %v558_v5, %v494_v22  ;;  %768 = vperm.xlu0 %959, %v733_v0   ;;  %v688_v26 = vpop.f32.mrf.mxu2 }
 0x119   :  { %v624_v32 = vadd.f32 %v623_v16, %v559_v25 }
 0x11b   :  { %v689_v37 = vadd.f32 %v688_v26, %v624_v32  ;;  %v626_v38 = vpop.f32.mrf.mxu1 }
 0x11c   :  { %v496_v42 = vpop.f32.mrf.mxu3 }
 0x11d   :  { %v497_v2 = vadd.f32 %v496_v42, %v432_v35  ;;  %v734_v20 = vadd.f32 %v1834_v60, %v689_v37 }
 0x11e   :  { %v564_v41 = vpop.f32.mrf.mxu0 }
 0x11f   :  { %v562_v43 = vadd.f32 %v561_v23, %v497_v2  ;;  %771 = vperm.xlu1 %960, %v734_v20   ;;  %v691_v3 = vpop.f32.mrf.mxu2 }
 0x121   :  { %v627_v45 = vadd.f32 %v626_v38, %v562_v43 }
 0x123   :  { %v692_v12 = vadd.f32 %v691_v3, %v627_v45  ;;  %v629_v46 = vpop.f32.mrf.mxu1 }
 0x124   :  { %v499_v15 = vpop.f32.mrf.mxu3 }
 0x125   :  { %v735_v18 = vadd.f32 %v1834_v60, %v692_v12  ;;  %v500_v62 = vadd.f32 %v499_v15, %v1651_v51 }
 0x126   :  { %v567_v47 = vpop.f32.mrf.mxu0 }
 0x127   :  { %v565_v40 = vadd.f32 %v564_v41, %v500_v62  ;;  %774 = vperm.xlu1 %960, %v735_v18   ;;  %v694_v49 = vpop.f32.mrf.mxu2 }
 0x129   :  { %v630_v21 = vadd.f32 %v629_v46, %v565_v40 }
 0x12b   :  { %v695_v30 = vadd.f32 %v694_v49, %v630_v21  ;;  %v632_v33 = vpop.f32.mrf.mxu1 }
 0x12c   :  { %v502_v36 = vpop.f32.mrf.mxu3 }
 0x12d   :  { %v503_v52 = vadd.f32 %v502_v36, %v1668_v48  ;;  %v736_v39 = vadd.f32 %v1834_v60, %v695_v30 }
 0x12e   :  { %v570_v54 = vpop.f32.mrf.mxu0 }
 0x12f   :  { %v568_v55 = vadd.f32 %v567_v47, %v503_v52  ;;  %777 = vperm.xlu2 %961, %v736_v39   ;;  %v697_v56 = vpop.f32.mrf.mxu2 }
 0x131   :  { %v633_v58 = vadd.f32 %v632_v33, %v568_v55 }
 0x133   :  { %v698_v59 = vadd.f32 %v697_v56, %v633_v58  ;;  %v635_v61 = vpop.f32.mrf.mxu1 }
 0x134   :  { %v505_v51 = vpop.f32.mrf.mxu3 }
 0x135   :  { %v737_v63 = vadd.f32 %v1834_v60, %v698_v59  ;;  %v506_v9 = vadd.f32 %v505_v51, %v1685_v4 }
 0x136   :  { %v573_v13 = vpop.f32.mrf.mxu0 }
 0x137   :  { %v571_v53 = vadd.f32 %v570_v54, %v506_v9  ;;  %780 = vperm.xlu2 %961, %v737_v63   ;;  %v700_v1 = vpop.f32.mrf.mxu2 }
 0x139   :  { %v636_v5 = vadd.f32 %v635_v61, %v571_v53 }
 0x13b   :  { %v701_v48 = vadd.f32 %v700_v1, %v636_v5  ;;  %v638_v7 = vpop.f32.mrf.mxu1 }
 0x13c   :  { %v508_v10 = vpop.f32.mrf.mxu3 }
 0x13d   :  { %v738_v24 = vadd.f32 %v1834_v60, %v701_v48  ;;  %v509_v28 = vadd.f32 %v508_v10, %v1702_v19 }
 0x13e   :  { %v576_v11 = vpop.f32.mrf.mxu0 }
 0x13f   :  { %v574_v14 = vadd.f32 %v573_v13, %v509_v28  ;;  %783 = vperm.xlu0 %959, %v738_v24   ;;  %v703_v16 = vpop.f32.mrf.mxu2 }
 0x141   :  { %v639_v17 = vadd.f32 %v638_v7, %v574_v14 }
 0x143   :  { %v704_v0 = vadd.f32 %v703_v16, %v639_v17  ;;  %v641_v22 = vpop.f32.mrf.mxu1 }
 0x144   :  { %v511_v4 = vpop.f32.mrf.mxu3 }
 0x145   :  { %v739_v23 = vadd.f32 %v1834_v60, %v704_v0  ;;  %v512_v25 = vadd.f32 %v511_v4, %v1719_v34 }
 0x146   :  { %v579_v26 = vpop.f32.mrf.mxu0 }
 0x147   :  { %v577_v31 = vadd.f32 %v576_v11, %v512_v25  ;;  %786 = vperm.xlu1 %960, %v739_v23   ;;  %v706_v32 = vpop.f32.mrf.mxu2 }
 0x149   :  { %v642_v35 = vadd.f32 %v641_v22, %v577_v31 }
 0x14b   :  { %v707_v37 = vadd.f32 %v706_v32, %v642_v35  ;;  %v644_v38 = vpop.f32.mrf.mxu1 }
 0x14c   :  { %v514_v19 = vpop.f32.mrf.mxu3 }
 0x14d   :  { %v740_v42 = vadd.f32 %v1834_v60, %v707_v37  ;;  %v515_v2 = vadd.f32 %v514_v19, %v1736_v44 }
 0x14e   :  { %v582_v20 = vpop.f32.mrf.mxu0 }
 0x14f   :  { %v580_v41 = vadd.f32 %v579_v26, %v515_v2  ;;  %789 = vperm.xlu2 %961, %v740_v42   ;;  %v709_v43 = vpop.f32.mrf.mxu2 }
 0x151   :  { %v645_v3 = vadd.f32 %v644_v38, %v580_v41 }
 0x153   :  { %v710_v45 = vadd.f32 %v709_v43, %v645_v3  ;;  %v647_v12 = vpop.f32.mrf.mxu1 }
 0x154   :  { %v517_v34 = vpop.f32.mrf.mxu3 }
 0x155   :  { %v741_v46 = vadd.f32 %v1834_v60, %v710_v45  ;;  %v518_v15 = vadd.f32 %v517_v34, %v1753_v50 }
 0x156   :  { %v585_v18 = vpop.f32.mrf.mxu0 }
 0x157   :  { %v583_v62 = vadd.f32 %v582_v20, %v518_v15  ;;  %792 = vperm.xlu0 %959, %v741_v46   ;;  %v712_v47 = vpop.f32.mrf.mxu2  ;;  %v812_v20 = vlaneseq }
 0x159   :  { %v648_v40 = vadd.f32 %v647_v12, %v583_v62  ;;  %v1868_v3 = vand.u32 127, %v812_v20 }
 0x15b   :  { %v713_v49 = vadd.f32 %v712_v47, %v648_v40  ;;  %v650_v21 = vpop.f32.mrf.mxu1  ;;  %v815_v45 = vadd.s32 4294967288, %v1868_v3  ;;  %v823_v34 = vadd.s32 4294967272, %v1868_v3  ;;  %v827_v40 = vadd.s32 4294967264, %v1868_v3 }
 0x15c   :  { %v520_v44 = vpop.f32.mrf.mxu3 }
 0x15d   :  { %v742_v30 = vadd.f32 %v1834_v60, %v713_v49  ;;  %v521_v33 = vadd.f32 %v520_v44, %v1770_v57  ;;  %v835_v44 = vadd.s32 4294967248, %v1868_v3 }
 0x15e   :  { %v588_v36 = vpop.f32.mrf.mxu0 }
 0x15f   :  { %v586_v52 = vadd.f32 %v585_v18, %v521_v33  ;;  %795 = vperm.xlu1 %960, %v742_v30   ;;  %v715_v39 = vpop.f32.mrf.mxu2  ;;  %v831_v30 = vadd.s32 4294967256, %v1868_v3 }
 0x161   :  { %v651_v54 = vadd.f32 %v650_v21, %v586_v52  ;;  %v839_v52 = vadd.s32 4294967240, %v1868_v3 }
 0x163   :  { %v716_v55 = vadd.f32 %v715_v39, %v651_v54  ;;  %v653_v56 = vpop.f32.mrf.mxu1 }
 0x164   :  { %v523_v50 = vpop.f32.mrf.mxu3 }
 0x165   :  { %v743_v58 = vadd.f32 %v1834_v60, %v716_v55  ;;  %v524_v59 = vadd.f32 %v523_v50, %v1785_v8 }
 0x166   :  { %v591_v63 = vpop.f32.mrf.mxu0 }
 0x167   :  { %v589_v61 = vadd.f32 %v588_v36, %v524_v59  ;;  %798 = vperm.xlu2 %961, %v743_v58   ;;  %v718_v51 = vpop.f32.mrf.mxu2 }
 0x169   :  { %v654_v9 = vadd.f32 %v653_v56, %v589_v61  ;;  %v847_v61 = vadd.s32 4294967224, %v1868_v3 }
 0x16b   :  { %v719_v13 = vadd.f32 %v718_v51, %v654_v9  ;;  %v656_v53 = vpop.f32.mrf.mxu1  ;;  %v843_v51 = vadd.s32 4294967232, %v1868_v3 }
 0x16c   :  { %v526_v57 = vpop.f32.mrf.mxu3 }
 0x16d   :  { %v744_v1 = vadd.f32 %v1834_v60, %v719_v13  ;;  %v527_v5 = vadd.f32 %v526_v57, %v1800_v29 }
 0x16e   :  { %v594_v24 = vpop.f32.mrf.mxu0 }
 0x16f   :  { %v592_v48 = vadd.f32 %v591_v63, %v527_v5  ;;  %801 = vperm.xlu0 %959, %v744_v1   ;;  %v721_v7 = vpop.f32.mrf.mxu2  ;;  %v851_v63 = vadd.s32 4294967216, %v1868_v3 }
 0x171   :  { %v657_v10 = vadd.f32 %v656_v53, %v592_v48 }
 0x173   :  { %v722_v28 = vadd.f32 %v721_v7, %v657_v10  ;;  %v659_v8 = vpop.f32.mrf.mxu1  ;;  %v859_v7 = vadd.s32 4294967200, %v1868_v3  ;;  %v855_v10 = vadd.s32 4294967208, %v1868_v3 }
 0x174   :  { %v529_v11 = vpop.f32.mrf.mxu3 }
 0x175   :  { %v745_v14 = vadd.f32 %v1834_v60, %v722_v28  ;;  %v530_v16 = vadd.f32 %v529_v11, %v1815_v6  ;;  %v863_v28 = vadd.s32 4294967192, %v1868_v3 }
 0x176   :  { %v597_v25 = vpop.f32.mrf.mxu0 }
 0x177   :  { %v595_v17 = vadd.f32 %v594_v24, %v530_v16  ;;  %804 = vperm.xlu1 %960, %v745_v14   ;;  %v724_v0 = vpop.f32.mrf.mxu2 }
 0x179   :  { %v660_v22 = vadd.f32 %v659_v8, %v595_v17 }
 0x17b   :  { %v725_v4 = vadd.f32 %v724_v0, %v660_v22  ;;  %v662_v31 = vpop.f32.mrf.mxu1 }
 0x17c   :  { %v532_v23 = vpop.f32.mrf.mxu3 }
 0x17d   :  { %v746_v29 = vadd.f32 %v1834_v60, %v725_v4  ;;  %v533_v26 = vadd.f32 %v532_v23, %v1824_v27  ;;  %v819_v27 = vadd.s32 4294967280, %v1868_v3  ;;  %v867_v4 = vadd.s32 4294967184, %v1868_v3 }
 0x17f   :  { %v598_v32 = vadd.f32 %v597_v25, %v533_v26  ;;  %807 = vperm.xlu2 %961, %v746_v29   ;;  %v727_v35 = vpop.f32.mrf.mxu2  ;;  %v871_v29 = vadd.s32 4294967176, %v1868_v3 }
 0x181   :  { %v663_v37 = vadd.f32 %v662_v31, %v598_v32  ;;  %v766_v6 = vpop.permute.xlu0 %765 }
 0x182   :  { %v814_v62 = vperm.slane %v766_v6, %v1868_v3 }
 0x183   :  { %v728_v38 = vadd.f32 %v727_v35, %v663_v37 }
 0x185   :  { %v747_v19 = vadd.f32 %v1834_v60, %v728_v38 }
 0x187   :  { %810 = vperm.xlu0 %959, %v747_v19  }
 0x189   :  { %v778_v2 = vpop.permute.xlu2 %777  ;;  %v769_v41 = vpop.permute.xlu0 %768 }
 0x18a   :  { %v816_v46 = vperm.slane %v769_v41, %v815_v45  ;;  %v828_v39 = vperm.slane %v778_v2, %v827_v40 }
 0x18c   :  { %v818_v49 = vsel %vm817_vm1, %v816_v46, %v814_v62 }
 0x191   :  { %v772_v42 = vpop.permute.xlu1 %771  ;;  %v781_v12 = vpop.permute.xlu2 %780 }
 0x192   :  { %v820_v60 = vperm.slane %v772_v42, %v819_v27  ;;  %v832_v58 = vperm.slane %v781_v12, %v831_v30 }
 0x194   :  { %v822_v21 = vsel %vm821_vm2, %v820_v60, %v818_v49 }
 0x199   :  { %v775_v43 = vpop.permute.xlu1 %774 }
 0x19a   :  { %v824_v47 = vperm.slane %v775_v43, %v823_v34 }
 0x19c   :  { %v826_v33 = vsel %vm825_vm3, %v824_v47, %v822_v21 }
 0x19d   :  { %v830_v55 = vsel %vm829_vm4, %v828_v39, %v826_v33 }
 0x19e   :  { %v834_v9 = vsel %vm833_vm5, %v832_v58, %v830_v55 }
 0x1a9   :  { %v790_v36 = vpop.permute.xlu2 %789 }
 0x1aa   :  { %v844_v5 = vperm.slane %v790_v36, %v843_v51 }
 0x1b1   :  { %v784_v15 = vpop.permute.xlu0 %783 }
 0x1b2   :  { %v836_v56 = vperm.slane %v784_v15, %v835_v44 }
 0x1b4   :  { %v838_v13 = vsel %vm837_vm6, %v836_v56, %v834_v9 }
 0x1b9   :  { %v787_v18 = vpop.permute.xlu1 %786 }
 0x1ba   :  { %v840_v59 = vperm.slane %v787_v18, %v839_v52 }
 0x1bc   :  { %v842_v53 = vsel %vm841_vm7, %v840_v59, %v838_v13 }
 0x1bd   :  { %v846_v11 = vsel %vm845_vm8, %v844_v5, %v842_v53 }
 0x1c1   :  { %v799_v57 = vpop.permute.xlu2 %798 }
 0x1c2   :  { %v856_v0 = vperm.slane %v799_v57, %v855_v10 }
 0x1c9   :  { %v793_v54 = vpop.permute.xlu0 %792 }
 0x1ca   :  { %v848_v1 = vperm.slane %v793_v54, %v847_v61 }
 0x1cc   :  { %v850_v14 = vsel %vm849_vm9, %v848_v1, %v846_v11 }
 0x1d1   :  { %v796_v50 = vpop.permute.xlu1 %795 }
 0x1d2   :  { %v852_v48 = vperm.slane %v796_v50, %v851_v63 }
 0x1d4   :  { %v854_v16 = vsel %vm853_vm10, %v852_v48, %v850_v14 }
 0x1d5   :  { %v858_v25 = vsel %vm857_vm11, %v856_v0, %v854_v16 }
 0x1d9   :  { %v808_v23 = vpop.permute.xlu2 %807 }
 0x1da   :  { %v868_v32 = vperm.slane %v808_v23, %v867_v4 }
 0x1e1   :  { %v802_v24 = vpop.permute.xlu0 %801 }
 0x1e2   :  { %v860_v17 = vperm.slane %v802_v24, %v859_v7 }
 0x1e4   :  { %v862_v26 = vsel %vm861_vm12, %v860_v17, %v858_v25 }
 0x1e9   :  { %v805_v8 = vpop.permute.xlu1 %804 }
 0x1ea   :  { %v864_v22 = vperm.slane %v805_v8, %v863_v28 }
 0x1ec   :  { %v866_v31 = vsel %vm865_vm13, %v864_v22, %v862_v26 }
 0x1ed   :  { %v870_v38 = vsel %vm869_vm14, %v868_v32, %v866_v31 }
 0x1f9   :  { %v811_v35 = vpop.permute.xlu0 %810 }
 0x1fa   :  { %v872_v37 = vperm.slane %v811_v35, %v871_v29 }
 0x1fc   :  { %v874_v19 = vsel %vm873_vm15, %v872_v37, %v870_v38 }
 0x1fd   :  { %876 = vst [vmem:[#allocation3] sm:$0x1] %v874_v19 }
 0x1fe   :  { %887 = dma.vmem_to_hbm [thread:$0]  %s883_s23, 16, %s885_s26, [#allocation4]  }
 0x1ff   :  { %986 = dma.done.wait [#allocation4], 16  }
 0x200   :  { %987 = vsyncadd [#allocation4], 4294967280 }
 0x201   :  { %892 = vsyncpa [#allocation4], 1 }

</bundles_post_ra>
